<compile_context>
chip_gen: v7x
topology: tpu7x:2x2x1
jax: 0.10.0
libtpu: 0.0.40
codegen_flags: <defaults>
</compile_context>

<pallas_src>
import functools

import jax
import jax.numpy as jnp
from jax import lax
from jax.experimental import pallas as pl
from jax.experimental.pallas import tpu as pltpu


def _sop_kernel(x_ref, o_ref, gram_ref, rsum_ref, *, inv_hw):
    """One (Bt, C, TK) spatial tile of one group of batch elements.

    Accumulates Gram matrix and per-channel row sums in f32 scratch; on the
    last spatial tile finalizes cov = gram * inv_hw - mean @ mean^T.
    """
    k = pl.program_id(1)

    @pl.when(k == 0)
    def _():
        gram_ref[...] = jnp.zeros_like(gram_ref)
        rsum_ref[...] = jnp.zeros_like(rsum_ref)

    x = x_ref[...].astype(jnp.float32)  # (Bt, C, TK)

    # Batched Gram update: contract the spatial (last) axis of both operands,
    # batch over the leading Bt axis. No explicit transpose.
    gram_ref[...] += lax.dot_general(
        x, x,
        dimension_numbers=(((2,), (2,)), ((0,), (0,))),
        preferred_element_type=jnp.float32)
    rsum_ref[...] += jnp.sum(x, axis=2, keepdims=True)

    @pl.when(k == pl.num_programs(1) - 1)
    def _():
        mean = rsum_ref[...] * inv_hw  # (Bt, C, 1), f32
        # Batched outer product mean @ mean^T via dot_general (K = 1), again
        # avoiding an explicit transpose.
        outer = lax.dot_general(
            mean, mean,
            dimension_numbers=(((2,), (2,)), ((0,), (0,))),
            preferred_element_type=jnp.float32)  # (Bt, C, C)
        o_ref[...] = (gram_ref[...] * inv_hw - outer).astype(o_ref.dtype)


def second_order_pooling(x, *, tk_target=512, vmem_budget=24 * 1024 * 1024):
    """x: (B, C, H, W) -> (B, C*C) covariance representation (matches PyTorch ref)."""
    B, C, H, W = x.shape
    HW = H * W

    # ---- tile-size selection ------------------------------------------------
    # Spatial tile TK: multiple of 128 (lane width / MXU friendly), capped at
    # tk_target; pad HW with zeros up to a multiple of TK (exact for this
    # Gram-minus-outer formulation since the true HW is used for scaling).
    hw_pad = max(128, ((HW + 127) // 128) * 128)
    tk = min(hw_pad, tk_target)
    hw_pad = ((HW + tk - 1) // tk) * tk

    itemsize = jnp.dtype(x.dtype).itemsize

    def _vmem_need(bt):
        inp = 2 * bt * C * tk * itemsize        # double-buffered input tiles
        out = 2 * bt * C * C * itemsize         # double-buffered output tiles
        scr = bt * C * C * 4 + bt * C * 4       # f32 accumulators
        return inp + out + scr

    # Batch Bt elements per grid step (amortizes ~0.35us/step overhead and
    # fills sublanes for small C), subject to the VMEM budget.
    bt = 1
    for cand in range(min(B, 8), 0, -1):
        if B % cand == 0 and _vmem_need(cand) <= vmem_budget:
            bt = cand
            break

    # Raise the scoped VMEM limit above the 16/32 MiB defaults, but stay well
    # under v7x's 64 MiB physical VMEM.
    vmem_limit = int(min(max(_vmem_need(bt) + (8 << 20), 32 << 20), 48 << 20))

    # ---- layout prep (cheap wrapper work) -----------------------------------
    x3 = x.reshape(B, C, HW)
    if hw_pad != HW:
        x3 = jnp.pad(x3, ((0, 0), (0, 0), (0, hw_pad - HW)))

    grid = (B // bt, hw_pad // tk)

    cov = pl.pallas_call(
        functools.partial(_sop_kernel, inv_hw=1.0 / float(HW)),
        out_shape=jax.ShapeDtypeStruct((B, C, C), x.dtype),
        grid_spec=pltpu.PrefetchScalarGridSpec(
            num_scalar_prefetch=0,
            grid=grid,
            in_specs=[pl.BlockSpec((bt, C, tk), lambda b, k: (b, 0, k))],
            out_specs=pl.BlockSpec((bt, C, C), lambda b, k: (b, 0, 0)),
            scratch_shapes=[
                pltpu.VMEM((bt, C, C), jnp.float32),   # Gram accumulator
                pltpu.VMEM((bt, C, 1), jnp.float32),   # per-channel row sums
            ],
        ),
        compiler_params=pltpu.CompilerParams(
            dimension_semantics=("parallel", "arbitrary"),
            vmem_limit_bytes=vmem_limit),
        cost_estimate=pl.CostEstimate(
            flops=2 * B * C * C * HW,
            transcendentals=0,
            bytes_accessed=B * C * HW * itemsize + B * C * C * itemsize),
    )(x3)

    return cov.reshape(B, C * C)


if __name__ == "__main__":
    key = jax.random.PRNGKey(0)
    B, C, H, W = 2, 4, 16, 16
    x = jax.random.normal(key, (B, C, H, W), dtype=jnp.float32)

    out = second_order_pooling(x)
    jax.block_until_ready(out)

    # Pure-JAX reference (matches the PyTorch module semantics).
    x3 = x.reshape(B, C, H * W)
    xc = x3 - x3.mean(axis=2, keepdims=True)
    ref = (jnp.einsum("bcs,bds->bcd", xc, xc) / (H * W)).reshape(B, C * C)

    assert out.shape == (B, C * C)
    assert jnp.allclose(out, ref, atol=1e-4, rtol=1e-4)

    print("KERNEL_OK")
</pallas_src>

<mosaic_0001>
module attributes {stable_mosaic.version = 11 : i64} {
  func.func @_sop_kernel(%arg0: i32, %arg1: i32, %arg2: memref<2x4x256xf32, #tpu.memory_space<vmem>>, %arg3: memref<2x4x4xf32, #tpu.memory_space<vmem>>, %arg4: memref<2x4x4xf32, #tpu.memory_space<vmem>>, %arg5: memref<2x4x1xf32, #tpu.memory_space<vmem>>) attributes {dimension_semantics = [#tpu.dimension_semantics<parallel>, #tpu.dimension_semantics<arbitrary>], iteration_bounds = array<i64: 1, 1>, scalar_prefetch = 0 : i64, scratch_operands = 2 : i64, tpu.core_type = #tpu.core_type<tc>, window_params = [{transform_indices = @transform_0, window_bounds = array<i64: 2, 4, 256>}, {transform_indices = @transform_1, window_bounds = array<i64: 2, 4, 4>}]} {
    %c0_i32 = arith.constant 0 : i32
    %0 = arith.cmpi eq, %arg1, %c0_i32 : i32
    %1 = arith.extui %0 : i1 to i32
    %c0_i32_0 = arith.constant 0 : i32
    %2 = arith.cmpi ne, %1, %c0_i32_0 : i32
    scf.if %2 {
      %cst_18 = arith.constant 0.000000e+00 : f32
      %16 = vector.broadcast %cst_18 : f32 to vector<2x4x4xf32>
      %c0_19 = arith.constant 0 : index
      %c0_20 = arith.constant 0 : index
      %c0_21 = arith.constant 0 : index
      %17 = vector.load %arg4[%c0_19, %c0_20, %c0_21] : memref<2x4x4xf32, #tpu.memory_space<vmem>>, vector<2x4x4xf32>
      tpu.vector_store %arg4[%c0_19, %c0_20, %c0_21], %16 {strides = array<i32>} : memref<2x4x4xf32, #tpu.memory_space<vmem>>, vector<2x4x4xf32>,
      %cst_22 = arith.constant 0.000000e+00 : f32
      %18 = vector.broadcast %cst_22 : f32 to vector<2x4x1xf32>
      %c0_23 = arith.constant 0 : index
      %c0_24 = arith.constant 0 : index
      %c0_25 = arith.constant 0 : index
      %19 = vector.load %arg5[%c0_23, %c0_24, %c0_25] : memref<2x4x1xf32, #tpu.memory_space<vmem>>, vector<2x4x1xf32>
      tpu.vector_store %arg5[%c0_23, %c0_24, %c0_25], %18 {strides = array<i32>} : memref<2x4x1xf32, #tpu.memory_space<vmem>>, vector<2x4x1xf32>,
    } else {
    }
    %c0 = arith.constant 0 : index
    %c0_1 = arith.constant 0 : index
    %c0_2 = arith.constant 0 : index
    %3 = vector.load %arg2[%c0, %c0_1, %c0_2] : memref<2x4x256xf32, #tpu.memory_space<vmem>>, vector<2x4x256xf32>
    %c0_3 = arith.constant 0 : index
    %c0_4 = arith.constant 0 : index
    %c0_5 = arith.constant 0 : index
    %4 = vector.load %arg4[%c0_3, %c0_4, %c0_5] : memref<2x4x4xf32, #tpu.memory_space<vmem>>, vector<2x4x4xf32>
    %cst = arith.constant dense<0.000000e+00> : vector<2x4x4xf32>
    %5 = tpu.matmul %3, %3, %cst {dimension_numbers = #tpu.dot_dimension_numbers<[2], [2], [1], [1], [0, 0, 0, 1, 1, 1], [0], [0]>} : vector<2x4x256xf32>, vector<2x4x256xf32>, vector<2x4x4xf32> -> vector<2x4x4xf32>
    %6 = arith.addf %4, %5 : vector<2x4x4xf32>
    %c0_6 = arith.constant 0 : index
    %c0_7 = arith.constant 0 : index
    %c0_8 = arith.constant 0 : index
    %7 = vector.load %arg4[%c0_6, %c0_7, %c0_8] : memref<2x4x4xf32, #tpu.memory_space<vmem>>, vector<2x4x4xf32>
    tpu.vector_store %arg4[%c0_6, %c0_7, %c0_8], %6 {strides = array<i32>} : memref<2x4x4xf32, #tpu.memory_space<vmem>>, vector<2x4x4xf32>,
    %c0_9 = arith.constant 0 : index
    %c0_10 = arith.constant 0 : index
    %c0_11 = arith.constant 0 : index
    %8 = vector.load %arg5[%c0_9, %c0_10, %c0_11] : memref<2x4x1xf32, #tpu.memory_space<vmem>>, vector<2x4x1xf32>
    %cst_12 = arith.constant dense<0.000000e+00> : vector<2x4xf32>
    %9 = vector.multi_reduction <add>, %3, %cst_12 [2] : vector<2x4x256xf32> to vector<2x4xf32>
    %10 = vector.shape_cast %9 : vector<2x4xf32> to vector<2x4x1xf32>
    %11 = arith.addf %8, %10 : vector<2x4x1xf32>
    %c0_13 = arith.constant 0 : index
    %c0_14 = arith.constant 0 : index
    %c0_15 = arith.constant 0 : index
    %12 = vector.load %arg5[%c0_13, %c0_14, %c0_15] : memref<2x4x1xf32, #tpu.memory_space<vmem>>, vector<2x4x1xf32>
    tpu.vector_store %arg5[%c0_13, %c0_14, %c0_15], %11 {strides = array<i32>} : memref<2x4x1xf32, #tpu.memory_space<vmem>>, vector<2x4x1xf32>,
    %c0_i32_16 = arith.constant 0 : i32
    %13 = arith.cmpi eq, %arg1, %c0_i32_16 : i32
    %14 = arith.extui %13 : i1 to i32
    %c0_i32_17 = arith.constant 0 : i32
    %15 = arith.cmpi ne, %14, %c0_i32_17 : i32
    scf.if %15 {
      %c0_18 = arith.constant 0 : index
      %c0_19 = arith.constant 0 : index
      %c0_20 = arith.constant 0 : index
      %16 = vector.load %arg5[%c0_18, %c0_19, %c0_20] : memref<2x4x1xf32, #tpu.memory_space<vmem>>, vector<2x4x1xf32>
      %cst_21 = arith.constant 3.906250e-03 : f32
      %17 = vector.broadcast %cst_21 : f32 to vector<2x4x1xf32>
      %18 = arith.mulf %16, %17 : vector<2x4x1xf32>
      %cst_22 = arith.constant dense<0.000000e+00> : vector<2x4x4xf32>
      %19 = tpu.matmul %18, %18, %cst_22 {dimension_numbers = #tpu.dot_dimension_numbers<[2], [2], [1], [1], [0, 0, 0, 1, 1, 1], [0], [0]>} : vector<2x4x1xf32>, vector<2x4x1xf32>, vector<2x4x4xf32> -> vector<2x4x4xf32>
      %c0_23 = arith.constant 0 : index
      %c0_24 = arith.constant 0 : index
      %c0_25 = arith.constant 0 : index
      %20 = vector.load %arg4[%c0_23, %c0_24, %c0_25] : memref<2x4x4xf32, #tpu.memory_space<vmem>>, vector<2x4x4xf32>
      %cst_26 = arith.constant 3.906250e-03 : f32
      %21 = vector.broadcast %cst_26 : f32 to vector<2x4x4xf32>
      %22 = arith.mulf %20, %21 : vector<2x4x4xf32>
      %23 = arith.subf %22, %19 : vector<2x4x4xf32>
      %c0_27 = arith.constant 0 : index
      %c0_28 = arith.constant 0 : index
      %c0_29 = arith.constant 0 : index
      %24 = vector.load %arg3[%c0_27, %c0_28, %c0_29] : memref<2x4x4xf32, #tpu.memory_space<vmem>>, vector<2x4x4xf32>
      tpu.vector_store %arg3[%c0_27, %c0_28, %c0_29], %23 {strides = array<i32>} : memref<2x4x4xf32, #tpu.memory_space<vmem>>, vector<2x4x4xf32>,
    } else {
    }
    return
  }
  func.func @transform_0(%arg0: i32, %arg1: i32) -> (i32, i32, i32) {
    %c0_i32 = arith.constant 0 : i32
    %c0_i32_0 = arith.constant 0 : i32
    return %arg0, %c0_i32, %arg1 : i32, i32, i32
  }
  func.func @transform_1(%arg0: i32, %arg1: i32) -> (i32, i32, i32) {
    %c0_i32 = arith.constant 0 : i32
    %c0_i32_0 = arith.constant 0 : i32
    %c0_i32_1 = arith.constant 0 : i32
    return %arg0, %c0_i32, %c0_i32_0 : i32, i32, i32
  }
}

</mosaic_0001>

<bundles_post_ra>
// kernel: tpu_custom_call.1
= control target key start
LH: loop header
LB: loop body
LE: loop exit
PB: predicated region body
PF: predicated region fallthrough
CT: control target
= control target key end

     0   :  { %6 = vsyncpa [#allocation5], 0  ;;  %s513_s0 = inlined_call_operand.hbm [shape: f32[2,4,256], index: 0, kind: input, shape index: {}]   ;;  %s514_s1 = inlined_call_operand.hbm [shape: f32[2,4,4], index: 1, kind: output, shape index: {}]  }
   0x1   :  { %7 = vsyncpa [#allocation6], 0  ;;  %s461_s6 = smov [#allocation4]   ;;  %s413_s10 = scalar_lea.hbm %s513_s0, 256 }
   0x2   :  { %s13_s7 = sshll.u32 %s461_s6, 4  ;;  %p414_p0 = scmp.ne.s32.totalorder %s513_s0, %s413_s10  ;;  %s14_s7 = int_to_ptr.vmem [resolvable:$true] %s13_s7 }
   0x3   :  { %p417_p1 = scmp.lt.u32.totalorder %s413_s10, %s513_s0 }
   0x5   :  { %p419_p2 = pnand %p417_p1, %p414_p0 }
   0x7   :  { %422 = shalt.err (!%p419_p2)
}
   0x8   :  { %s423_s15 = scalar_lea.vmem %s14_s7, 256  ;;  %p428_p4 = scmp.lt.s32.totalorder %s14_s7, %s14_s7 }
   0x9   :  { %p424_p3 = scmp.ne.s32.totalorder %s14_s7, %s423_s15  ;;  %p429_p5 = scmp.lt.s32.totalorder %s423_s15, %s423_s15 }
   0xb   :  { %p430_p6 = por %p429_p5, %p428_p4 }
   0xd   :  { %p431_p7 = pnand %p430_p6, %p424_p3 }
   0xf   :  { %434 = shalt.err (!%p431_p7)
}
  0x10   :  { %s462_s16 = smov 128   ;;  %s463_s17 = smov 8  }
  0x11   :  { %19 = dma.hbm_to_vmem [thread:$0]  %s513_s0, 256, %s14_s7, [#allocation5], %s462_s16, %s462_s16, %s463_s17  }
  0x12   :  { %457 = dma.done.wait [#allocation5], 256  }
  0x13   :  { %458 = vsyncadd [#allocation5], 4294967040  ;;  %vm30_vm0 = vcmask 3072   ;;  %v464_v0 = vmov 0.0   ;;  %vm190_vm1 = vcmask 1043456   ;;  %v33_v1 = vld [vmem:[#allocation4] sm:$0xff] }
  0x14   :  { %31 = vst.msk [vmem:[#allocation3] sm:$0xf] %vm30_vm0, %v464_v0  ;;  %32 = vst.msk [vmem:[#allocation3 + $0x4] sm:$0xf] %vm30_vm0, %v464_v0  ;;  %v34_v2 = vld [vmem:[#allocation4 + $0x8] sm:$0xff]  ;;  %v38_v3 = vcombine.high %v33_v1, %v33_v1  ;;  %v191_v4 = vsel %vm190_vm1, %v33_v1, 0.0 }
  0x15   :  { %v111_v5 = vcombine.high %v34_v2, %v34_v2  ;;  %v196_v7 = vsel %vm190_vm1, %v34_v2, 0.0  ;;  %vm465_vm2 = vmmov 0   ;;  %vm27_vm3 = vcmask 27648   ;;  %s466_s0 = smov [#allocation7]  }
  0x16   :  { %v192_v6 = vsel %vm190_vm1, %v38_v3, 0.0  ;;  %40 = vmatprep.subr.mxu0 %v38_v3  ;;  %104 = vmatprep.mubr.f32.mxu0 %v38_v3  ;;  %28 = vst.msk [vmem:[#allocation2] sm:$0xf] %vm27_vm3, %v464_v0  ;;  %29 = vst.msk [vmem:[#allocation2 + $0x4] sm:$0xf] %vm27_vm3, %v464_v0  ;;  %vm213_vm4 = vcmask 7168  }
  0x17   :  { %v197_v8 = vsel %vm190_vm1, %v111_v5, 0.0  ;;  %v193_v9 = vadd.f32 %v192_v6, %v191_v4  ;;  %41 = vmatpush1.xpose.msra.mxu0 %v33_v1  ;;  %113 = vmatprep.subr.mxu1 %v111_v5  ;;  %s373_s20 = sshll.u32 %s466_s0, 4  ;;  %s374_s20 = int_to_ptr.vmem [resolvable:$true] %s373_s20 }
  0x18   :  { %114 = vmatpush1.xpose.msra.mxu1 %v34_v2  ;;  %177 = vmatprep.mubr.f32.mxu1 %v111_v5  ;;  %v198_v10 = vadd.f32 %v197_v8, %v196_v7  ;;  %s435_s21 = scalar_lea.vmem %s374_s20, 128  ;;  %p440_p9 = scmp.lt.s32.totalorder %s374_s20, %s374_s20 }
  0x19   :  { %194 = vadd.xlane.f32.xlu0 %v193_v9  ;;  %393 = vmatprep.subr.mxu0 %v464_v0  ;;  %p436_p8 = scmp.ne.s32.totalorder %s374_s20, %s435_s21  ;;  %p441_p10 = scmp.lt.s32.totalorder %s435_s21, %s435_s21 }
  0x1a   :  { %105 = vmatmul.mubr.f32.vlgmr.msra.gmra.mrb[0].mxu0 %v33_v1  ;;  %398 = vmatprep.subr.mxu1 %v464_v0 }
  0x1b   :  { %178 = vmatmul.mubr.f32.vlgmr.msra.gmra.mrb[0].mxu1 %v34_v2  ;;  %395 = vmatprep.mubr.msk.f32.mxu0 %vm465_vm2, %v464_v0  ;;  %v188_v11 = vld [vmem:[#allocation3] sm:$0xf]  ;;  %v189_v14 = vld [vmem:[#allocation3 + $0x4] sm:$0xf]  ;;  %p442_p11 = por %p441_p10, %p440_p9 }
  0x1c   :  { %400 = vmatprep.mubr.msk.f32.mxu1 %vm465_vm2, %v464_v0 }
  0x1d   :  { %199 = vadd.xlane.f32.xlu0 %v198_v10  ;;  %v35_v21 = vld [vmem:[#allocation2] sm:$0xf]  ;;  %v36_v22 = vld [vmem:[#allocation2 + $0x4] sm:$0xf]  ;;  %p443_p12 = pnand %p442_p11, %p436_p8 }
  0xa6   :  { %v195_v12 = vpop.xlane.xlu0 %194 }
  0xa7   :  { %v201_v13 = vadd.f32 %v195_v12, %v188_v11 }
  0xa9   :  { %204 = vst.msk [vmem:[#allocation3] sm:$0xf] %vm30_vm0, %v201_v13 }
  0xaa   :  { %v200_v15 = vpop.xlane.xlu0 %199 }
  0xab   :  { %v202_v16 = vadd.f32 %v200_v15, %v189_v14 }
  0xad   :  { %205 = vst.msk [vmem:[#allocation3 + $0x4] sm:$0xf] %vm30_vm0, %v202_v16 }
  0xb0   :  { %v209_v17 = vld [vmem:[#allocation3] sm:$0xf] }
  0xb1   :  { %v211_v18 = vmul.f32 0.00390625, %v209_v17 }
  0xb3   :  { %394 = vmatpush3.xpose.msk.msra.mxu0 %vm213_vm4, %v211_v18 }
  0xb4   :  { %v210_v19 = vld [vmem:[#allocation3 + $0x4] sm:$0xf] }
  0xb5   :  { %v212_v20 = vmul.f32 0.00390625, %v210_v19 }
  0xb6   :  { %396 = vmatmul.mubr.msk.f32.vlgmr.msra.gmra.mrb[2].mxu0 %vm213_vm4, %v211_v18 }
  0xb7   :  { %399 = vmatpush3.xpose.msk.msra.mxu1 %vm213_vm4, %v212_v20 }
  0xba   :  { %401 = vmatmul.mubr.msk.f32.vlgmr.msra.gmra.mrb[2].mxu1 %vm213_vm4, %v212_v20 }
  0xed   :  { %v106_v23 = vpop.f32.mrb[0].mxu0 }
  0xee   :  { %v183_v24 = vadd.f32 %v106_v23, %v35_v21  ;;  %v179_v25 = vpop.f32.mrb[0].mxu1  ;;  %v108_v26 = vpop.f32.mrb[1].mxu0 }
  0xef   :  { %v184_v27 = vadd.f32 %v179_v25, %v36_v22  ;;  %v181_v28 = vpop.f32.mrb[1].mxu1 }
  0xf0   :  { %186 = vst.msk [vmem:[#allocation2] sm:$0xf] %vm27_vm3, %v183_v24 }
  0xf1   :  { %187 = vst.msk [vmem:[#allocation2 + $0x4] sm:$0xf] %vm27_vm3, %v184_v27 }
  0xf7   :  { %v360_v29 = vld [vmem:[#allocation2] sm:$0xf] }
  0xf8   :  { %v362_v30 = vmul.f32 0.00390625, %v360_v29  ;;  %v361_v31 = vld [vmem:[#allocation2 + $0x4] sm:$0xf] }
  0xf9   :  { %v363_v35 = vmul.f32 0.00390625, %v361_v31 }
 0x189   :  { %v283_v32 = vpop.f32.mrb[2].mxu0 }
 0x18a   :  { %v364_v33 = vsub.f32 %v362_v30, %v283_v32  ;;  %v397_v34 = vpop.f32.mrb[3].mxu0 }
 0x18c   :  { %366 = vst.msk [vmem:[#allocation7] sm:$0xf] %vm27_vm3, %v364_v33 }
 0x18d   :  { %v356_v36 = vpop.f32.mrb[2].mxu1 }
 0x18e   :  { %v365_v37 = vsub.f32 %v363_v35, %v356_v36  ;;  %v402_v38 = vpop.f32.mrb[3].mxu1 }
 0x190   :  { %367 = vst.msk [vmem:[#allocation7 + $0x4] sm:$0xf] %vm27_vm3, %v365_v37 }
 0x191   :  { %446 = shalt.err (!%p443_p12)
}
 0x192   :  { %s447_s24 = scalar_lea.hbm %s514_s1, 128 }
 0x193   :  { %p448_p13 = scmp.ne.s32.totalorder %s514_s1, %s447_s24  ;;  %p451_p0 = scmp.lt.u32.totalorder %s447_s24, %s514_s1 }
 0x195   :  { %p453_p1 = pnand %p451_p0, %p448_p13 }
 0x197   :  { %456 = shalt.err (!%p453_p1)
}
 0x198   :  { %s467_s29 = smov 64   ;;  %s468_s30 = smov 4  }
 0x199   :  { %379 = dma.vmem_to_hbm [thread:$0]  %s374_s20, 128, %s514_s1, [#allocation6], %s467_s29, %s467_s29, %s468_s30  }
 0x19a   :  { %459 = dma.done.wait [#allocation6], 128  }
 0x19b   :  { %460 = vsyncadd [#allocation6], 4294967168 }
 0x19c   :  { %383 = vsyncpa [#allocation5], 1 }
 0x19d   :  { %384 = vsyncpa [#allocation6], 1 }

</bundles_post_ra>
